<compile_context>
chip_gen: v5e
topology: v5e:2x2
jax: 0.10.0
libtpu: 0.0.40
codegen_flags: <defaults>
</compile_context>

<pallas_src>
import functools

import jax
import jax.numpy as jnp
from jax.experimental import pallas as pl
from jax.experimental.pallas import tpu as pltpu


def _mlp_kernel_t(xT_ref, w_hid_ref, w_out_ref, oT_ref):
    """Fused 3-matmul MLP on one batch-lane tile, transposed layout.

    Shapes (tile_n = lane tile along the batch dim):
      xT_ref    : [in_size, tile_n]
      w_hid_ref : [hidden, hidden + in_size + 2] = [ W2^T | W01^T | b01 | b2 ]
      w_out_ref : [out_size, hidden + 1]         = [ W3^T | b3 ]
      oT_ref    : [out_size, tile_n]
    """
    h_dim = w_hid_ref.shape[0]
    in_size = w_hid_ref.shape[1] - h_dim - 2

    # Static slices of the packed resident operands (views -> cheap loads).
    w2t = w_hid_ref[:, 0:h_dim]                                  # [h, h]
    w01 = w_hid_ref[:, h_dim:h_dim + in_size]                    # [h, in]
    b01 = w_hid_ref[:, h_dim + in_size:h_dim + in_size + 1]      # [h, 1]
    b2 = w_hid_ref[:, h_dim + in_size + 1:h_dim + in_size + 2]   # [h, 1]
    w3t = w_out_ref[:, 0:h_dim]                                  # [out, h]
    b3 = w_out_ref[:, h_dim:h_dim + 1]                           # [out, 1]

    xT = xT_ref[...].astype(jnp.float32)                         # [in, n]

    # Fused layers 0+1 (Linear(in,h) folded into Linear(h,h)), then ReLU.
    if in_size == 1:
        # K=1 contraction -> outer product on the VPU; skips the MXU entirely.
        h = w01 * xT + b01                                       # [h, n]
    else:
        h = jnp.dot(w01, xT, preferred_element_type=jnp.float32) + b01
    h = jnp.maximum(h, 0.0)

    # Layer 2: Linear(h, h) + ReLU.
    h = jnp.dot(w2t, h, preferred_element_type=jnp.float32) + b2
    h = jnp.maximum(h, 0.0)

    # Layer 3: Linear(h, out).  out_size sits on sublanes; the store stays
    # lane-dense along the batch tile.
    out = jnp.dot(w3t, h, preferred_element_type=jnp.float32) + b3
    oT_ref[...] = out.astype(oT_ref.dtype)


def prepare_params(params):
    """One-time offline prep: fold layer 0 into layer 1, transpose to
    [fan_out, fan_in], and pack everything into two resident arrays.

    params: wK: [fan_in, fan_out], bK: [1, fan_out] ("math" layout).
    Returns:
      w_hid: [hidden, hidden + in_size + 2] = [ W2^T | W01^T | b01 | b2 ]
      w_out: [out_size, hidden + 1]         = [ W3^T | b3 ]
    """
    w0, b0 = params["w0"], params["b0"]
    w1, b1 = params["w1"], params["b1"]
    w2, b2 = params["w2"], params["b2"]
    w3, b3 = params["w3"], params["b3"]
    with jax.default_matmul_precision("float32"):
        w01 = w0 @ w1                       # [in, hidden]
        b01 = b0 @ w1 + b1                  # [1, hidden]
    w_hid = jnp.concatenate([w2.T, w01.T, b01.T, b2.T],
                            axis=1).astype(jnp.float32)
    w_out = jnp.concatenate([w3.T, b3.T], axis=1).astype(jnp.float32)
    return w_hid, w_out


@functools.partial(jax.jit, static_argnames=("tile_n",))
def cdf_params_forward(x, w_hid, w_out, *, tile_n=None):
    """CDFParams forward.  x: [N, input_size] f32 -> [N, output_size] f32.

    w_hid / w_out come from prepare_params() (pre-folded, pre-transposed,
    pre-packed — no per-call transposes of the weights).
    """
    n, in_size = x.shape
    hidden = w_hid.shape[0]
    out_size = w_out.shape[0]
    assert w_hid.shape[1] == hidden + in_size + 2
    assert w_out.shape[1] == hidden + 1

    # Overhead-aware tile choice: one big step for small N, 2048-lane tiles
    # (multiple steps, megacore-parallel) for large N.
    if tile_n is None:
        n128 = pl.cdiv(n, 128) * 128
        tile_n = n128 if n128 <= 4096 else 2048
    assert tile_n % 128 == 0

    n_pad = pl.cdiv(n, tile_n) * tile_n
    num_steps = n_pad // tile_n

    # [N, in] -> [in, N]: a free reshape for in_size == 1, else a transpose.
    xT = x.reshape(1, n) if in_size == 1 else x.T
    if n_pad != n:
        xT = jnp.pad(xT, ((0, 0), (0, n_pad - n)))

    # Constant index_map -> DMA'd once, resident in VMEM across grid steps.
    resident = lambda arr: pl.BlockSpec(arr.shape, lambda i: (0, 0))

    oT = pl.pallas_call(
        _mlp_kernel_t,
        out_shape=jax.ShapeDtypeStruct((out_size, n_pad), jnp.float32),
        grid_spec=pltpu.PrefetchScalarGridSpec(
            num_scalar_prefetch=0,
            grid=(num_steps,),
            in_specs=[
                pl.BlockSpec((in_size, tile_n), lambda i: (0, i)),   # x^T
                resident(w_hid),                                     # packed L1+L2
                resident(w_out),                                     # packed L3
            ],
            out_specs=pl.BlockSpec((out_size, tile_n), lambda i: (0, i)),
        ),
        compiler_params=pltpu.CompilerParams(
            dimension_semantics=(("parallel",) if num_steps > 1
                                 else ("arbitrary",))),
    )(xT, w_hid, w_out)

    if n_pad != n:
        oT = oT[:, :n]
    # NOTE: if the consumer accepts [out_size, N], return oT directly and
    # skip this final (cheap, [out_size, N]) transpose.
    return oT.T


def init_cdf_params(key, input_size, hidden_size, output_size):
    """Deterministic init mimicking PyTorch nn.Linear default
    (uniform(-1/sqrt(fan_in), 1/sqrt(fan_in)))."""
    dims = [(input_size, hidden_size),
            (hidden_size, hidden_size),
            (hidden_size, hidden_size),
            (hidden_size, output_size)]
    params = {}
    for idx, (fan_in, fan_out) in enumerate(dims):
        key, kw, kb = jax.random.split(key, 3)
        bound = 1.0 / (fan_in ** 0.5)
        params[f"w{idx}"] = jax.random.uniform(
            kw, (fan_in, fan_out), jnp.float32, -bound, bound)
        params[f"b{idx}"] = jax.random.uniform(
            kb, (1, fan_out), jnp.float32, -bound, bound)
    return params


def _reference_forward(x, params):
    with jax.default_matmul_precision("float32"):
        h = x @ params["w0"] + params["b0"]
        h = jnp.maximum(h @ params["w1"] + params["b1"], 0.0)
        h = jnp.maximum(h @ params["w2"] + params["b2"], 0.0)
        return h @ params["w3"] + params["b3"]


if __name__ == "__main__":
    INPUT_SIZE = 1         # module default
    HIDDEN_SIZE = 64       # module default
    NUM_HIDDEN_LAYERS = 3  # structure baked into the kernel above
    OUTPUT_SIZE = 2        # e.g. (mu, sigma) of a Normal CDF
    N = 1024               # small demo batch -> single 1024-lane grid step

    key = jax.random.PRNGKey(0)
    key, kx = jax.random.split(key)
    x = jax.random.normal(kx, (N, INPUT_SIZE), jnp.float32)
    params = init_cdf_params(key, INPUT_SIZE, HIDDEN_SIZE, OUTPUT_SIZE)

    # One-time fold/transpose/pack, outside the per-call forward.
    w_hid, w_out = prepare_params(params)

    out = cdf_params_forward(x, w_hid, w_out)
    out = jax.block_until_ready(out)

    ref = _reference_forward(x, params)
    assert out.shape == (N, OUTPUT_SIZE)
    max_err = float(jnp.max(jnp.abs(out - ref)))
    assert jnp.allclose(out, ref, atol=1e-4, rtol=1e-4), (
        f"mismatch vs reference (max abs err {max_err:.3e})")

    print("KERNEL_OK")
</pallas_src>

<mosaic_0001>
module attributes {stable_mosaic.version = 11 : i64} {
  func.func @_mlp_kernel_t(%arg0: i32, %arg1: memref<1x1024xf32, #tpu.memory_space<vmem>>, %arg2: memref<64x67xf32, #tpu.memory_space<vmem>>, %arg3: memref<2x65xf32, #tpu.memory_space<vmem>>, %arg4: memref<2x1024xf32, #tpu.memory_space<vmem>>) attributes {dimension_semantics = [#tpu.dimension_semantics<arbitrary>], iteration_bounds = array<i64: 1>, scalar_prefetch = 0 : i64, scratch_operands = 0 : i64, tpu.core_type = #tpu.core_type<tc>, window_params = [{transform_indices = @transform_0, window_bounds = array<i64: 1, 1024>}, {pipeline_mode = #tpu.pipeline_mode<synchronous>, transform_indices = @transform_1, window_bounds = array<i64: 64, 67>}, {pipeline_mode = #tpu.pipeline_mode<synchronous>, transform_indices = @transform_2, window_bounds = array<i64: 2, 65>}, {transform_indices = @transform_3, window_bounds = array<i64: 2, 1024>}]} {
    %c0 = arith.constant 0 : index
    %c0_0 = arith.constant 0 : index
    %0 = vector.load %arg2[%c0, %c0_0] : memref<64x67xf32, #tpu.memory_space<vmem>>, vector<64x64xf32>
    %c0_1 = arith.constant 0 : index
    %c64 = arith.constant 64 : index
    %1 = vector.load %arg2[%c0_1, %c64] : memref<64x67xf32, #tpu.memory_space<vmem>>, vector<64x1xf32>
    %c0_2 = arith.constant 0 : index
    %c65 = arith.constant 65 : index
    %2 = vector.load %arg2[%c0_2, %c65] : memref<64x67xf32, #tpu.memory_space<vmem>>, vector<64x1xf32>
    %c0_3 = arith.constant 0 : index
    %c66 = arith.constant 66 : index
    %3 = vector.load %arg2[%c0_3, %c66] : memref<64x67xf32, #tpu.memory_space<vmem>>, vector<64x1xf32>
    %c0_4 = arith.constant 0 : index
    %c0_5 = arith.constant 0 : index
    %4 = vector.load %arg3[%c0_4, %c0_5] : memref<2x65xf32, #tpu.memory_space<vmem>>, vector<2x64xf32>
    %c0_6 = arith.constant 0 : index
    %c64_7 = arith.constant 64 : index
    %5 = vector.load %arg3[%c0_6, %c64_7] : memref<2x65xf32, #tpu.memory_space<vmem>>, vector<2x1xf32>
    %c0_8 = arith.constant 0 : index
    %c0_9 = arith.constant 0 : index
    %6 = vector.load %arg1[%c0_8, %c0_9] : memref<1x1024xf32, #tpu.memory_space<vmem>>, vector<1x1024xf32>
    %7 = vector.broadcast %1 : vector<64x1xf32> to vector<64x1024xf32>
    %8 = vector.broadcast %6 : vector<1x1024xf32> to vector<64x1024xf32>
    %9 = arith.mulf %7, %8 : vector<64x1024xf32>
    %10 = vector.broadcast %2 : vector<64x1xf32> to vector<64x1024xf32>
    %11 = arith.addf %9, %10 : vector<64x1024xf32>
    %cst = arith.constant 0.000000e+00 : f32
    %12 = vector.broadcast %cst : f32 to vector<64x1024xf32>
    %13 = arith.maximumf %11, %12 : vector<64x1024xf32>
    %cst_10 = arith.constant dense<0.000000e+00> : vector<64x1024xf32>
    %14 = tpu.matmul %0, %13, %cst_10 {dimension_numbers = #tpu.dot_dimension_numbers<[1], [0], [0], [1], [0, 0, 1, 1], [], []>} : vector<64x64xf32>, vector<64x1024xf32>, vector<64x1024xf32> -> vector<64x1024xf32>
    %15 = vector.broadcast %3 : vector<64x1xf32> to vector<64x1024xf32>
    %16 = arith.addf %14, %15 : vector<64x1024xf32>
    %cst_11 = arith.constant 0.000000e+00 : f32
    %17 = vector.broadcast %cst_11 : f32 to vector<64x1024xf32>
    %18 = arith.maximumf %16, %17 : vector<64x1024xf32>
    %cst_12 = arith.constant dense<0.000000e+00> : vector<2x1024xf32>
    %19 = tpu.matmul %4, %18, %cst_12 {dimension_numbers = #tpu.dot_dimension_numbers<[1], [0], [0], [1], [0, 0, 1, 1], [], []>} : vector<2x64xf32>, vector<64x1024xf32>, vector<2x1024xf32> -> vector<2x1024xf32>
    %20 = vector.broadcast %5 : vector<2x1xf32> to vector<2x1024xf32>
    %21 = arith.addf %19, %20 : vector<2x1024xf32>
    %c0_13 = arith.constant 0 : index
    %c0_14 = arith.constant 0 : index
    %22 = vector.load %arg4[%c0_13, %c0_14] : memref<2x1024xf32, #tpu.memory_space<vmem>>, vector<2x1024xf32>
    tpu.vector_store %arg4[%c0_13, %c0_14], %21 {strides = array<i32>} : memref<2x1024xf32, #tpu.memory_space<vmem>>, vector<2x1024xf32>,
    return
  }
  func.func @transform_0(%arg0: i32) -> (i32, i32) {
    %c0_i32 = arith.constant 0 : i32
    %c0_i32_0 = arith.constant 0 : i32
    return %c0_i32, %arg0 : i32, i32
  }
  func.func @transform_1(%arg0: i32) -> (i32, i32) {
    %c0_i32 = arith.constant 0 : i32
    %c0_i32_0 = arith.constant 0 : i32
    %c0_i32_1 = arith.constant 0 : i32
    return %c0_i32, %c0_i32_0 : i32, i32
  }
  func.func @transform_2(%arg0: i32) -> (i32, i32) {
    %c0_i32 = arith.constant 0 : i32
    %c0_i32_0 = arith.constant 0 : i32
    %c0_i32_1 = arith.constant 0 : i32
    return %c0_i32, %c0_i32_0 : i32, i32
  }
  func.func @transform_3(%arg0: i32) -> (i32, i32) {
    %c0_i32 = arith.constant 0 : i32
    %c0_i32_0 = arith.constant 0 : i32
    return %c0_i32, %arg0 : i32, i32
  }
}

</mosaic_0001>

<bundles_post_ra>
// kernel: cdf_params_forward.1
= control target key start
LH: loop header
LB: loop body
LE: loop exit
PB: predicated region body
PF: predicated region fallthrough
CT: control target
= control target key end

     0   :  { %8 = vsyncpa [#allocation3], 0  ;;  %s1830_s0 = inlined_call_operand.hbm [shape: f32[1,1024], index: 0, kind: input, shape index: {}]   ;;  %s1831_s1 = inlined_call_operand.hbm [shape: f32[64,67], index: 1, kind: input, shape index: {}]   ;;  %s1832_s2 = inlined_call_operand.vmem [shape: f32[2,65], index: 2, kind: input, shape index: {}]   ;;  %s1833_s3 = inlined_call_operand.hbm [shape: f32[2,1024], index: 3, kind: output, shape index: {}]  }
   0x1   :  { %9 = vsyncpa [#allocation6], 0 }
   0x2   :  { %10 = vsyncpa [#allocation4], 0  ;;  %s16_s14 = sshll.u32 %s1830_s0, 4  ;;  %s1162_s15 = smov [#allocation2]   ;;  %s17_s14 = int_to_ptr.hbm [resolvable:$true] %s16_s14 }
   0x3   :  { %s18_s16 = sshll.u32 %s1162_s15, 4  ;;  %s26_s19 = sshll.u32 %s1831_s1, 4  ;;  %s19_s16 = int_to_ptr.vmem [resolvable:$true] %s18_s16  ;;  %s27_s19 = int_to_ptr.hbm [resolvable:$true] %s26_s19 }
   0x4   :  { %21 = dma.hbm_to_vmem [thread:$0]  %s17_s14, 128, %s19_s16, [#allocation3]  }
   0x5   :  { %s1163_s20 = smov [#allocation5]   ;;  %s1164_s22 = smov 128  }
   0x6   :  { %s28_s21 = sshll.u32 %s1163_s20, 4  ;;  %s1165_s23 = smov 8   ;;  %s29_s21 = int_to_ptr.vmem [resolvable:$true] %s28_s21 }
   0x7   :  { %34 = dma.hbm_to_vmem [thread:$0]  %s27_s19, 1024, %s29_s21, [#allocation6], %s1164_s22, %s1164_s22, %s1165_s23  }
   0x8   :  { %1156 = dma.done.wait [#allocation3], 128  }
   0x9   :  { %1157 = vsyncadd [#allocation3], 4294967168 }
   0xa   :  { %1158 = dma.done.wait [#allocation6], 1024  }
   0xb   :  { %1159 = vsyncadd [#allocation6], 4294966272  ;;  %v1166_v0 = vmov 65   ;;  %v1167_v1 = vmov 64   ;;  %v1197_v2 = vld [vmem:[#allocation5 + $0x38] sm:$0xff]  ;;  %v1201_v3 = vld [vmem:[#allocation5 + $0x30] sm:$0xff] }
   0xc   :  { %1070 = vset.pattern.permute.xlu1 %v1166_v0  ;;  %1069 = vset.pattern.permute.xlu0 %v1167_v1  ;;  %v1204_v4 = vld [vmem:[#allocation5 + $0x28] sm:$0xff]  ;;  %v1206_v5 = vld [vmem:[#allocation5 + $0x20] sm:$0xff]  ;;  %v1213_v6 = vld [vmem:[#allocation5 + $0x18] sm:$0xff]  ;;  %vm368_vm0 = vcmask 523264   ;;  %vm958_vm1 = vcmask 1041408   ;;  %vm960_vm2 = vcmask 1045508  }
   0xd   :  { %1072 = vset.pattern.permute.xlu2 %v1166_v0  ;;  %205 = vperm.xlu1 %1070, %v1197_v2   ;;  %v1218_v7 = vld [vmem:[#allocation5 + $0x10] sm:$0xff]  ;;  %v1220_v8 = vld [vmem:[#allocation5 + $0x8] sm:$0xff]  ;;  %v1226_v9 = vld [vmem:[#allocation5] sm:$0xff]  ;;  %vm962_vm3 = vcmask 1043456   ;;  %s978_s27 = sshll.u32 %s1833_s3, 4  ;;  %s979_s27 = int_to_ptr.hbm [resolvable:$true] %s978_s27 }
   0xe   :  { %92 = vperm.xlu0 %1069, %v1197_v2   ;;  %201 = vperm.xlu2 %1072, %v1201_v3   ;;  %v1235_v11 = vld [vmem:[#allocation2] sm:$0xff] }
   0xf   :  { %v1238_v12 = vperm.slane %v1235_v11, 0  ;;  %v1241_v13 = vperm.slane %v1235_v11, 1  ;;  %v1244_v14 = vperm.slane %v1235_v11, 2  ;;  %v1247_v15 = vperm.slane %v1235_v11, 3 }
  0x15   :  { %1071 = vset.pattern.permute.xlu1 %v1167_v1 }
  0x16   :  { %87 = vperm.xlu0 %1069, %v1201_v3   ;;  %82 = vperm.xlu1 %1071, %v1204_v4  }
  0x17   :  { %1073 = vset.pattern.permute.xlu2 %v1167_v1 }
  0x18   :  { %77 = vperm.xlu2 %1073, %v1206_v5  }
  0x1e   :  { %1074 = vset.pattern.permute.xlu0 %v1166_v0  ;;  %72 = vperm.xlu1 %1071, %v1213_v6  }
  0x1f   :  { %197 = vperm.xlu0 %1074, %v1204_v4  }
  0x20   :  { %1075 = vset.pattern.permute.xlu2 %v1166_v0 }
  0x21   :  { %193 = vperm.xlu2 %1075, %v1206_v5  }
  0x26   :  { %67 = vperm.xlu1 %1071, %v1218_v7  }
  0x27   :  { %1076 = vset.pattern.permute.xlu0 %v1167_v1 }
  0x28   :  { %62 = vperm.xlu0 %1076, %v1220_v8  }
  0x29   :  { %189 = vperm.xlu2 %1075, %v1213_v6  }
  0x2e   :  { %1077 = vset.pattern.permute.xlu1 %v1166_v0 }
  0x2f   :  { %185 = vperm.xlu1 %1077, %v1218_v7  }
  0x31   :  { %1078 = vset.pattern.permute.xlu2 %v1167_v1 }
  0x32   :  { %57 = vperm.xlu2 %1078, %v1226_v9  }
  0x37   :  { %181 = vperm.xlu1 %1077, %v1220_v8  }
  0x3a   :  { %1079 = vset.pattern.permute.xlu2 %v1166_v0 }
  0x3b   :  { %177 = vperm.xlu2 %1079, %v1226_v9  }
  0x68   :  { %v1233_v10 = vpop.permute.xlu2 %201 }
  0x72   :  { %v1249_v16 = vpop.permute.xlu2 %77 }
  0x73   :  { %v144_v42 = vmul.f32 %v1238_v12, %v1249_v16  ;;  %v145_v43 = vmul.f32 %v1241_v13, %v1249_v16  ;;  %v146_v44 = vmul.f32 %v1244_v14, %v1249_v16  ;;  %v147_v45 = vmul.f32 %v1247_v15, %v1249_v16 }
  0x7b   :  { %v1269_v32 = vpop.permute.xlu2 %193 }
  0x7c   :  { %v240_v56 = vadd.f32 %v1269_v32, %v144_v42  ;;  %v241_v57 = vadd.f32 %v1269_v32, %v145_v43  ;;  %v242_v58 = vadd.f32 %v1269_v32, %v146_v44  ;;  %v243_v59 = vadd.f32 %v1269_v32, %v147_v45 }
  0x7d   :  { %v1330_v43 = vperm.slane %v1235_v11, 4  ;;  %v1333_v44 = vperm.slane %v1235_v11, 5 }
  0x7f   :  { %v1251_v17 = vpop.permute.xlu1 %205 }
  0x80   :  { %v1253_v18 = vpop.permute.xlu0 %92 }
  0x81   :  { %v168_v19 = vmul.f32 %v1238_v12, %v1253_v18  ;;  %v169_v20 = vmul.f32 %v1241_v13, %v1253_v18  ;;  %v170_v21 = vmul.f32 %v1244_v14, %v1253_v18  ;;  %v171_v22 = vmul.f32 %v1247_v15, %v1253_v18 }
  0x83   :  { %v264_v23 = vadd.f32 %v1251_v17, %v168_v19  ;;  %v265_v24 = vadd.f32 %v1251_v17, %v169_v20  ;;  %v266_v25 = vadd.f32 %v1251_v17, %v170_v21  ;;  %v267_v26 = vadd.f32 %v1251_v17, %v171_v22  ;;  %v1309_v60 = vpop.permute.xlu2 %189 }
  0x85   :  { %v328_v27 = vmax.f32 %v264_v23, 0.0  ;;  %v329_v28 = vmax.f32 %v265_v24, 0.0  ;;  %v330_v29 = vmax.f32 %v266_v25, 0.0  ;;  %v331_v30 = vmax.f32 %v267_v26, 0.0 }
  0x87   :  { %393 = vmatpush.msra.mxu0 %v328_v27  ;;  %434 = vmatpush.msra.mxu1 %v329_v28 }
  0x88   :  { %475 = vmatpush.msra.mxu2 %v330_v29  ;;  %516 = vmatpush.msra.mxu3 %v331_v30  ;;  %v1267_v31 = vpop.permute.xlu0 %87  ;;  %v1271_v33 = vpop.permute.xlu1 %82 }
  0x89   :  { %v160_v34 = vmul.f32 %v1238_v12, %v1267_v31  ;;  %v161_v35 = vmul.f32 %v1241_v13, %v1267_v31  ;;  %v162_v36 = vmul.f32 %v1244_v14, %v1267_v31  ;;  %v163_v37 = vmul.f32 %v1247_v15, %v1267_v31 }
  0x8a   :  { %v152_v50 = vmul.f32 %v1238_v12, %v1271_v33  ;;  %v153_v51 = vmul.f32 %v1241_v13, %v1271_v33  ;;  %v154_v52 = vmul.f32 %v1244_v14, %v1271_v33  ;;  %v155_v53 = vmul.f32 %v1247_v15, %v1271_v33 }
  0x8b   :  { %v256_v38 = vadd.f32 %v1233_v10, %v160_v34  ;;  %v257_v39 = vadd.f32 %v1233_v10, %v161_v35  ;;  %v258_v40 = vadd.f32 %v1233_v10, %v162_v36  ;;  %v259_v41 = vadd.f32 %v1233_v10, %v163_v37 }
  0x8c   :  { %v304_v34 = vmax.f32 %v240_v56, 0.0  ;;  %v305_v35 = vmax.f32 %v241_v57, 0.0  ;;  %v306_v36 = vmax.f32 %v242_v58, 0.0  ;;  %v307_v37 = vmax.f32 %v243_v59, 0.0  ;;  %v1335_v45 = vpop.permute.xlu2 %57 }
  0x8d   :  { %v320_v46 = vmax.f32 %v256_v38, 0.0  ;;  %v321_v47 = vmax.f32 %v257_v39, 0.0  ;;  %v322_v48 = vmax.f32 %v258_v40, 0.0  ;;  %v323_v49 = vmax.f32 %v259_v41, 0.0 }
  0x8f   :  { %394 = vmatpush.msra.mxu0 %v320_v46  ;;  %435 = vmatpush.msra.mxu1 %v321_v47  ;;  %v1338_v46 = vperm.slane %v1235_v11, 6  ;;  %v148_v47 = vmul.f32 %v1330_v43, %v1249_v16 }
  0x90   :  { %476 = vmatpush.msra.mxu2 %v322_v48  ;;  %517 = vmatpush.msra.mxu3 %v323_v49  ;;  %v1303_v55 = vpop.permute.xlu1 %72  ;;  %v149_v48 = vmul.f32 %v1333_v44, %v1249_v16  ;;  %v1168_v49 = vmov 66  }
  0x91   :  { %v1301_v54 = vpop.permute.xlu0 %197  ;;  %v136_v19 = vmul.f32 %v1238_v12, %v1303_v55  ;;  %v137_v20 = vmul.f32 %v1241_v13, %v1303_v55  ;;  %v138_v21 = vmul.f32 %v1244_v14, %v1303_v55  ;;  %v139_v22 = vmul.f32 %v1247_v15, %v1303_v55  ;;  %1081 = vset.pattern.permute.xlu1 %v1168_v49 }
  0x92   :  { %v248_v61 = vadd.f32 %v1301_v54, %v152_v50  ;;  %v249_v62 = vadd.f32 %v1301_v54, %v153_v51  ;;  %v250_v63 = vadd.f32 %v1301_v54, %v154_v52  ;;  %v251_v0 = vadd.f32 %v1301_v54, %v155_v53  ;;  %361 = vperm.xlu1 %1081, %v1201_v3  }
  0x93   :  { %v232_v27 = vadd.f32 %v1309_v60, %v136_v19  ;;  %v233_v28 = vadd.f32 %v1309_v60, %v137_v20  ;;  %v234_v29 = vadd.f32 %v1309_v60, %v138_v21  ;;  %v235_v30 = vadd.f32 %v1309_v60, %v139_v22  ;;  %1080 = vset.pattern.permute.xlu0 %v1168_v49 }
  0x94   :  { %v312_v23 = vmax.f32 %v248_v61, 0.0  ;;  %v313_v24 = vmax.f32 %v249_v62, 0.0  ;;  %v314_v25 = vmax.f32 %v250_v63, 0.0  ;;  %v315_v26 = vmax.f32 %v251_v0, 0.0  ;;  %1082 = vset.pattern.permute.xlu2 %v1168_v49  ;;  %365 = vperm.xlu0 %1080, %v1197_v2  }
  0x95   :  { %v296_v38 = vmax.f32 %v232_v27, 0.0  ;;  %v297_v39 = vmax.f32 %v233_v28, 0.0  ;;  %v298_v41 = vmax.f32 %v234_v29, 0.0  ;;  %v299_v42 = vmax.f32 %v235_v30, 0.0  ;;  %357 = vperm.xlu2 %1082, %v1204_v4  }
  0x96   :  { %395 = vmatpush.msra.mxu0 %v312_v23  ;;  %436 = vmatpush.msra.mxu1 %v313_v24  ;;  %v1348_v51 = vperm.slane %v1235_v11, 7  ;;  %v150_v52 = vmul.f32 %v1338_v46, %v1249_v16  ;;  %v1362_v11 = vadd.f32 %v1269_v32, %v148_v47  ;;  %v1365_v59 = vadd.f32 %v1269_v32, %v149_v48 }
  0x97   :  { %477 = vmatpush.msra.mxu2 %v314_v25  ;;  %518 = vmatpush.msra.mxu3 %v315_v26  ;;  %v172_v21 = vmul.f32 %v1330_v43, %v1253_v18  ;;  %v173_v22 = vmul.f32 %v1333_v44, %v1253_v18  ;;  %v112_v29 = vmul.f32 %v1238_v12, %v1335_v45 }
  0x98   :  { %396 = vmatpush.msra.mxu0 %v304_v34  ;;  %437 = vmatpush.msra.mxu1 %v305_v35  ;;  %v1327_v40 = vpop.permute.xlu1 %67  ;;  %v151_v61 = vmul.f32 %v1348_v51, %v1249_v16  ;;  %v174_v16 = vmul.f32 %v1338_v46, %v1253_v18  ;;  %v1383_v23 = vadd.f32 %v1269_v32, %v150_v52  ;;  %v1394_v35 = vpop.permute.xlu2 %177 }
  0x99   :  { %478 = vmatpush.msra.mxu2 %v306_v36  ;;  %519 = vmatpush.msra.mxu3 %v307_v37  ;;  %v128_v50 = vmul.f32 %v1238_v12, %v1327_v40  ;;  %v129_v53 = vmul.f32 %v1241_v13, %v1327_v40  ;;  %v130_v56 = vmul.f32 %v1244_v14, %v1327_v40 }
  0x9a   :  { %397 = vmatpush.msra.mxu0 %v296_v38  ;;  %438 = vmatpush.msra.mxu1 %v297_v39  ;;  %v131_v57 = vmul.f32 %v1247_v15, %v1327_v40  ;;  %v1374_v20 = vpop.permute.xlu0 %62  ;;  %v113_v30 = vmul.f32 %v1241_v13, %v1335_v45  ;;  %v1392_v34 = vadd.f32 %v1269_v32, %v151_v61 }
  0x9b   :  { %479 = vmatpush.msra.mxu2 %v298_v41  ;;  %520 = vmatpush.msra.mxu3 %v299_v42  ;;  %v120_v28 = vmul.f32 %v1238_v12, %v1374_v20  ;;  %v121_v36 = vmul.f32 %v1241_v13, %v1374_v20  ;;  %v122_v37 = vmul.f32 %v1244_v14, %v1374_v20 }
  0x9c   :  { %v123_v38 = vmul.f32 %v1247_v15, %v1374_v20  ;;  %v114_v12 = vmul.f32 %v1244_v14, %v1335_v45  ;;  %v115_v32 = vmul.f32 %v1247_v15, %v1335_v45  ;;  %v175_v39 = vmul.f32 %v1348_v51, %v1253_v18  ;;  %353 = vperm.xlu1 %1081, %v1206_v5  }
  0x9d   :  { %v1409_v41 = vadd.f32 %v1251_v17, %v172_v21  ;;  %v1412_v13 = vadd.f32 %v1251_v17, %v173_v22  ;;  %v1415_v42 = vadd.f32 %v1251_v17, %v174_v16  ;;  %345 = vperm.xlu0 %1080, %v1218_v7   ;;  %v208_v15 = vadd.f32 %v1394_v35, %v112_v29 }
  0x9e   :  { %v209_v47 = vadd.f32 %v1394_v35, %v113_v30  ;;  %v164_v18 = vmul.f32 %v1330_v43, %v1267_v31  ;;  %v165_v48 = vmul.f32 %v1333_v44, %v1267_v31  ;;  %349 = vperm.xlu2 %1082, %v1213_v6   ;;  %v166_v61 = vmul.f32 %v1338_v46, %v1267_v31 }
  0x9f   :  { %v332_v22 = vmax.f32 %v1409_v41, 0.0  ;;  %v333_v16 = vmax.f32 %v1412_v13, 0.0  ;;  %v159_v13 = vmul.f32 %v1348_v51, %v1271_v33 }
  0xa1   :  { %v1359_v58 = vpop.permute.xlu1 %185 }
  0xa2   :  { %v224_v62 = vadd.f32 %v1359_v58, %v128_v50  ;;  %v225_v63 = vadd.f32 %v1359_v58, %v129_v53  ;;  %v226_v0 = vadd.f32 %v1359_v58, %v130_v56  ;;  %v227_v19 = vadd.f32 %v1359_v58, %v131_v57 }
  0xa3   :  { %v210_v56 = vadd.f32 %v1394_v35, %v114_v12  ;;  %v211_v57 = vadd.f32 %v1394_v35, %v115_v32  ;;  %v158_v12 = vmul.f32 %v1338_v46, %v1271_v33 }
  0xa4   :  { %v288_v24 = vmax.f32 %v224_v62, 0.0  ;;  %v289_v25 = vmax.f32 %v225_v63, 0.0  ;;  %v290_v26 = vmax.f32 %v226_v0, 0.0  ;;  %v291_v27 = vmax.f32 %v227_v19, 0.0  ;;  %341 = vperm.xlu1 %1081, %v1220_v8  }
  0xa5   :  { %v167_v62 = vmul.f32 %v1348_v51, %v1267_v31  ;;  %v156_v31 = vmul.f32 %v1330_v43, %v1271_v33  ;;  %v274_v29 = vmax.f32 %v210_v56, 0.0  ;;  %v275_v30 = vmax.f32 %v211_v57, 0.0  ;;  %1083 = vset.pattern.permute.xlu0 %v1167_v1 }
  0xa6   :  { %398 = vmatpush.msra.mxu0 %v288_v24  ;;  %439 = vmatpush.msra.mxu1 %v289_v25  ;;  %v271_v24 = vadd.f32 %v1251_v17, %v175_v39  ;;  %v260_v25 = vadd.f32 %v1233_v10, %v164_v18  ;;  %v334_v17 = vmax.f32 %v1415_v42, 0.0  ;;  %v308_v42 = vmax.f32 %v1362_v11, 0.0 }
  0xa7   :  { %480 = vmatpush.msra.mxu2 %v290_v26  ;;  %521 = vmatpush.msra.mxu3 %v291_v27  ;;  %v272_v26 = vmax.f32 %v208_v15, 0.0  ;;  %v273_v27 = vmax.f32 %v209_v47, 0.0  ;;  %v252_v39 = vadd.f32 %v1301_v54, %v156_v31  ;;  %v140_v15 = vmul.f32 %v1330_v43, %v1303_v55 }
  0xa8   :  { %v335_v32 = vmax.f32 %v271_v24, 0.0  ;;  %v141_v47 = vmul.f32 %v1333_v44, %v1303_v55  ;;  %v309_v18 = vmax.f32 %v1365_v59, 0.0  ;;  %v143_v11 = vmul.f32 %v1348_v51, %v1303_v55  ;;  %337 = vperm.xlu2 %1082, %v1226_v9  }
  0xa9   :  { %v1419_v14 = vpop.permute.xlu1 %181  ;;  %v316_v56 = vmax.f32 %v252_v39, 0.0  ;;  %v133_v59 = vmul.f32 %v1333_v44, %v1327_v40  ;;  %v124_v24 = vmul.f32 %v1330_v43, %v1374_v20  ;;  %v116_v31 = vmul.f32 %v1330_v43, %v1335_v45 }
  0xaa   :  { %v216_v49 = vadd.f32 %v1419_v14, %v120_v28  ;;  %v217_v50 = vadd.f32 %v1419_v14, %v121_v36  ;;  %v218_v52 = vadd.f32 %v1419_v14, %v122_v37  ;;  %v219_v53 = vadd.f32 %v1419_v14, %v123_v38 }
  0xab   :  { %v261_v28 = vadd.f32 %v1233_v10, %v165_v48  ;;  %v157_v36 = vmul.f32 %v1333_v44, %v1271_v33  ;;  %v262_v37 = vadd.f32 %v1233_v10, %v166_v61  ;;  %v263_v38 = vadd.f32 %v1233_v10, %v167_v62 }
  0xac   :  { %v280_v63 = vmax.f32 %v216_v49, 0.0  ;;  %v281_v0 = vmax.f32 %v217_v50, 0.0  ;;  %v282_v19 = vmax.f32 %v218_v52, 0.0  ;;  %v283_v21 = vmax.f32 %v219_v53, 0.0 }
  0xad   :  { %v253_v41 = vadd.f32 %v1301_v54, %v157_v36  ;;  %v254_v10 = vadd.f32 %v1301_v54, %v158_v12  ;;  %v255_v33 = vadd.f32 %v1301_v54, %v159_v13  ;;  %v142_v48 = vmul.f32 %v1338_v46, %v1303_v55 }
  0xae   :  { %399 = vmatpush.msra.mxu0 %v280_v63  ;;  %440 = vmatpush.msra.mxu1 %v281_v0  ;;  %v324_v49 = vmax.f32 %v260_v25, 0.0  ;;  %v325_v50 = vmax.f32 %v261_v28, 0.0  ;;  %v326_v52 = vmax.f32 %v262_v37, 0.0  ;;  %v327_v53 = vmax.f32 %v263_v38, 0.0 }
  0xaf   :  { %481 = vmatpush.msra.mxu2 %v282_v19  ;;  %522 = vmatpush.msra.mxu3 %v283_v21  ;;  %v317_v57 = vmax.f32 %v253_v41, 0.0  ;;  %v132_v54 = vmul.f32 %v1330_v43, %v1327_v40  ;;  %v318_v61 = vmax.f32 %v254_v10, 0.0  ;;  %v236_v55 = vadd.f32 %v1309_v60, %v140_v15 }
  0xb0   :  { %400 = vmatpush.msra.mxu0 %v272_v26  ;;  %441 = vmatpush.msra.mxu1 %v273_v27  ;;  %v237_v62 = vadd.f32 %v1309_v60, %v141_v47  ;;  %v134_v63 = vmul.f32 %v1338_v46, %v1327_v40  ;;  %v319_v0 = vmax.f32 %v255_v33, 0.0  ;;  %v238_v19 = vadd.f32 %v1309_v60, %v142_v48 }
  0xb1   :  { %482 = vmatpush.msra.mxu2 %v274_v29  ;;  %523 = vmatpush.msra.mxu3 %v275_v30  ;;  %v239_v21 = vadd.f32 %v1309_v60, %v143_v11  ;;  %v125_v25 = vmul.f32 %v1333_v44, %v1374_v20  ;;  %v126_v26 = vmul.f32 %v1338_v46, %v1374_v20  ;;  %v311_v60 = vmax.f32 %v1392_v34, 0.0 }
  0xb2   :  { %989 = vmatmul.msk.f32.vlgmr.msra.gmra.mxu0 %vm368_vm0, %v1226_v9  ;;  %997 = vmatmul.msk.f32.vlgmr.msra.gmra.mxu1 %vm368_vm0, %v1226_v9  ;;  %v228_v27 = vadd.f32 %v1359_v58, %v132_v54  ;;  %v230_v28 = vadd.f32 %v1359_v58, %v134_v63  ;;  %v117_v29 = vmul.f32 %v1333_v44, %v1335_v45  ;;  %v300_v43 = vmax.f32 %v236_v55, 0.0 }
  0xb3   :  { %1005 = vmatmul.msk.f32.vlgmr.msra.gmra.mxu2 %vm368_vm0, %v1226_v9  ;;  %1013 = vmatmul.msk.f32.vlgmr.msra.gmra.mxu3 %vm368_vm0, %v1226_v9  ;;  %v118_v30 = vmul.f32 %v1338_v46, %v1335_v45  ;;  %v301_v36 = vmax.f32 %v237_v62, 0.0  ;;  %v220_v44 = vadd.f32 %v1419_v14, %v124_v24  ;;  %v302_v46 = vmax.f32 %v238_v19, 0.0 }
  0xb4   :  { %557 = vmatpush.msrb.mxu0 %v332_v22  ;;  %598 = vmatpush.msrb.mxu1 %v333_v16  ;;  %v135_v22 = vmul.f32 %v1348_v51, %v1327_v40  ;;  %v310_v16 = vmax.f32 %v1383_v23, 0.0  ;;  %v229_v40 = vadd.f32 %v1359_v58, %v133_v59  ;;  %v127_v23 = vmul.f32 %v1348_v51, %v1374_v20 }
  0xb5   :  { %639 = vmatpush.msrb.mxu2 %v334_v17  ;;  %680 = vmatpush.msrb.mxu3 %v335_v32  ;;  %v119_v20 = vmul.f32 %v1348_v51, %v1335_v45  ;;  %v221_v17 = vadd.f32 %v1419_v14, %v125_v25  ;;  %v303_v45 = vmax.f32 %v239_v21, 0.0  ;;  %v222_v51 = vadd.f32 %v1419_v14, %v126_v26 }
  0xb6   :  { %558 = vmatpush.msrb.mxu0 %v324_v49  ;;  %599 = vmatpush.msrb.mxu1 %v325_v50  ;;  %v231_v34 = vadd.f32 %v1359_v58, %v135_v22  ;;  %v223_v58 = vadd.f32 %v1419_v14, %v127_v23  ;;  %v292_v37 = vmax.f32 %v228_v27, 0.0  ;;  %v293_v38 = vmax.f32 %v229_v40, 0.0 }
  0xb7   :  { %640 = vmatpush.msrb.mxu2 %v326_v52  ;;  %681 = vmatpush.msrb.mxu3 %v327_v53  ;;  %v212_v12 = vadd.f32 %v1394_v35, %v116_v31  ;;  %v213_v32 = vadd.f32 %v1394_v35, %v117_v29  ;;  %v294_v39 = vmax.f32 %v230_v28, 0.0  ;;  %v214_v13 = vadd.f32 %v1394_v35, %v118_v30 }
  0xb8   :  { %559 = vmatpush.msrb.mxu0 %v316_v56  ;;  %600 = vmatpush.msrb.mxu1 %v317_v57  ;;  %v295_v41 = vmax.f32 %v231_v34, 0.0  ;;  %v215_v10 = vadd.f32 %v1394_v35, %v119_v20  ;;  %v285_v14 = vmax.f32 %v221_v17, 0.0  ;;  %v286_v15 = vmax.f32 %v222_v51, 0.0 }
  0xb9   :  { %641 = vmatpush.msrb.mxu2 %v318_v61  ;;  %682 = vmatpush.msrb.mxu3 %v319_v0  ;;  %v287_v47 = vmax.f32 %v223_v58, 0.0  ;;  %v276_v33 = vmax.f32 %v212_v12, 0.0  ;;  %v278_v48 = vmax.f32 %v214_v13, 0.0 }
  0xba   :  { %560 = vmatpush.msrb.mxu0 %v308_v42  ;;  %601 = vmatpush.msrb.mxu1 %v309_v18  ;;  %v284_v42 = vmax.f32 %v220_v44, 0.0  ;;  %v277_v18 = vmax.f32 %v213_v32, 0.0  ;;  %v279_v11 = vmax.f32 %v215_v10, 0.0 }
  0xbb   :  { %642 = vmatpush.msrb.mxu2 %v310_v16  ;;  %683 = vmatpush.msrb.mxu3 %v311_v60 }
  0xbc   :  { %990 = vmatmul.msk.f32.gmra.mxu0 %vm368_vm0, %v1220_v8  ;;  %998 = vmatmul.msk.f32.gmra.mxu1 %vm368_vm0, %v1220_v8 }
  0xbd   :  { %1006 = vmatmul.msk.f32.gmra.mxu2 %vm368_vm0, %v1220_v8  ;;  %1014 = vmatmul.msk.f32.gmra.mxu3 %vm368_vm0, %v1220_v8 }
  0xbe   :  { %561 = vmatpush.msrb.mxu0 %v300_v43  ;;  %602 = vmatpush.msrb.mxu1 %v301_v36 }
  0xbf   :  { %643 = vmatpush.msrb.mxu2 %v302_v46  ;;  %684 = vmatpush.msrb.mxu3 %v303_v45 }
  0xc0   :  { %562 = vmatpush.msrb.mxu0 %v292_v37  ;;  %603 = vmatpush.msrb.mxu1 %v293_v38 }
  0xc1   :  { %644 = vmatpush.msrb.mxu2 %v294_v39  ;;  %685 = vmatpush.msrb.mxu3 %v295_v41 }
  0xc2   :  { %563 = vmatpush.msrb.mxu0 %v284_v42  ;;  %604 = vmatpush.msrb.mxu1 %v285_v14 }
  0xc3   :  { %645 = vmatpush.msrb.mxu2 %v286_v15  ;;  %686 = vmatpush.msrb.mxu3 %v287_v47 }
  0xc4   :  { %564 = vmatpush.msrb.mxu0 %v276_v33  ;;  %605 = vmatpush.msrb.mxu1 %v277_v18 }
  0xc5   :  { %646 = vmatpush.msrb.mxu2 %v278_v48  ;;  %687 = vmatpush.msrb.mxu3 %v279_v11 }
  0xc6   :  { %991 = vmatmul.msk.f32.gmra.mxu0 %vm368_vm0, %v1218_v7  ;;  %999 = vmatmul.msk.f32.gmra.mxu1 %vm368_vm0, %v1218_v7 }
  0xc7   :  { %1007 = vmatmul.msk.f32.gmra.mxu2 %vm368_vm0, %v1218_v7  ;;  %1015 = vmatmul.msk.f32.gmra.mxu3 %vm368_vm0, %v1218_v7 }
  0xce   :  { %992 = vmatmul.msk.f32.gmra.mxu0 %vm368_vm0, %v1213_v6  ;;  %1000 = vmatmul.msk.f32.gmra.mxu1 %vm368_vm0, %v1213_v6 }
  0xcf   :  { %1008 = vmatmul.msk.f32.gmra.mxu2 %vm368_vm0, %v1213_v6  ;;  %1016 = vmatmul.msk.f32.gmra.mxu3 %vm368_vm0, %v1213_v6 }
  0xd6   :  { %993 = vmatmul.msk.f32.gmra.mxu0 %vm368_vm0, %v1206_v5  ;;  %1001 = vmatmul.msk.f32.gmra.mxu1 %vm368_vm0, %v1206_v5 }
  0xd7   :  { %1009 = vmatmul.msk.f32.gmra.mxu2 %vm368_vm0, %v1206_v5  ;;  %1017 = vmatmul.msk.f32.gmra.mxu3 %vm368_vm0, %v1206_v5 }
  0xde   :  { %994 = vmatmul.msk.f32.gmra.mxu0 %vm368_vm0, %v1204_v4  ;;  %1002 = vmatmul.msk.f32.gmra.mxu1 %vm368_vm0, %v1204_v4 }
  0xdf   :  { %1010 = vmatmul.msk.f32.gmra.mxu2 %vm368_vm0, %v1204_v4  ;;  %1018 = vmatmul.msk.f32.gmra.mxu3 %vm368_vm0, %v1204_v4 }
  0xe6   :  { %995 = vmatmul.msk.f32.gmra.mxu0 %vm368_vm0, %v1201_v3  ;;  %1003 = vmatmul.msk.f32.gmra.mxu1 %vm368_vm0, %v1201_v3 }
  0xe7   :  { %1011 = vmatmul.msk.f32.gmra.mxu2 %vm368_vm0, %v1201_v3  ;;  %1019 = vmatmul.msk.f32.gmra.mxu3 %vm368_vm0, %v1201_v3 }
  0xee   :  { %996 = vmatmul.msk.f32.gmra.mxu0 %vm368_vm0, %v1197_v2  ;;  %1004 = vmatmul.msk.f32.gmra.mxu1 %vm368_vm0, %v1197_v2 }
  0xef   :  { %1012 = vmatmul.msk.f32.gmra.mxu2 %vm368_vm0, %v1197_v2  ;;  %1020 = vmatmul.msk.f32.gmra.mxu3 %vm368_vm0, %v1197_v2  ;;  %v1671_v19 = vpop.permute.xlu2 %357 }
  0xf6   :  { %1021 = vmatmul.msk.f32.vlgmr.msrb.gmra.mxu0 %vm368_vm0, %v1226_v9  ;;  %1029 = vmatmul.msk.f32.vlgmr.msrb.gmra.mxu1 %vm368_vm0, %v1226_v9 }
  0xf7   :  { %1037 = vmatmul.msk.f32.vlgmr.msrb.gmra.mxu2 %vm368_vm0, %v1226_v9  ;;  %1045 = vmatmul.msk.f32.vlgmr.msrb.gmra.mxu3 %vm368_vm0, %v1226_v9 }
  0xf8   :  { %v1681_v30 = vpop.permute.xlu2 %349 }
  0xfe   :  { %1022 = vmatmul.msk.f32.gmra.mxu0 %vm368_vm0, %v1220_v8  ;;  %1030 = vmatmul.msk.f32.gmra.mxu1 %vm368_vm0, %v1220_v8 }
  0xff   :  { %1038 = vmatmul.msk.f32.gmra.mxu2 %vm368_vm0, %v1220_v8  ;;  %1046 = vmatmul.msk.f32.gmra.mxu3 %vm368_vm0, %v1220_v8 }
 0x104   :  { %v1669_v0 = vpop.permute.xlu1 %361 }
 0x106   :  { %1023 = vmatmul.msk.f32.gmra.mxu0 %vm368_vm0, %v1218_v7  ;;  %1031 = vmatmul.msk.f32.gmra.mxu1 %vm368_vm0, %v1218_v7  ;;  %v1673_v25 = vpop.permute.xlu0 %365 }
 0x107   :  { %1039 = vmatmul.msk.f32.gmra.mxu2 %vm368_vm0, %v1218_v7  ;;  %1047 = vmatmul.msk.f32.gmra.mxu3 %vm368_vm0, %v1218_v7 }
 0x10e   :  { %1024 = vmatmul.msk.f32.gmra.mxu0 %vm368_vm0, %v1213_v6  ;;  %1032 = vmatmul.msk.f32.gmra.mxu1 %vm368_vm0, %v1213_v6  ;;  %v1675_v26 = vpop.permute.xlu1 %353 }
 0x10f   :  { %1040 = vmatmul.msk.f32.gmra.mxu2 %vm368_vm0, %v1213_v6  ;;  %1048 = vmatmul.msk.f32.gmra.mxu3 %vm368_vm0, %v1213_v6  ;;  %v1687_v58 = vpop.permute.xlu0 %345 }
 0x116   :  { %1025 = vmatmul.msk.f32.gmra.mxu0 %vm368_vm0, %v1206_v5  ;;  %1033 = vmatmul.msk.f32.gmra.mxu1 %vm368_vm0, %v1206_v5 }
 0x117   :  { %1041 = vmatmul.msk.f32.gmra.mxu2 %vm368_vm0, %v1206_v5  ;;  %1049 = vmatmul.msk.f32.gmra.mxu3 %vm368_vm0, %v1206_v5 }
 0x11e   :  { %1026 = vmatmul.msk.f32.gmra.mxu0 %vm368_vm0, %v1204_v4  ;;  %1034 = vmatmul.msk.f32.gmra.mxu1 %vm368_vm0, %v1204_v4 }
 0x11f   :  { %1042 = vmatmul.msk.f32.gmra.mxu2 %vm368_vm0, %v1204_v4  ;;  %1050 = vmatmul.msk.f32.gmra.mxu3 %vm368_vm0, %v1204_v4 }
 0x126   :  { %1027 = vmatmul.msk.f32.gmra.mxu0 %vm368_vm0, %v1201_v3  ;;  %1035 = vmatmul.msk.f32.gmra.mxu1 %vm368_vm0, %v1201_v3 }
 0x127   :  { %1043 = vmatmul.msk.f32.gmra.mxu2 %vm368_vm0, %v1201_v3  ;;  %1051 = vmatmul.msk.f32.gmra.mxu3 %vm368_vm0, %v1201_v3 }
 0x12e   :  { %1028 = vmatmul.msk.f32.gmra.mxu0 %vm368_vm0, %v1197_v2  ;;  %1036 = vmatmul.msk.f32.gmra.mxu1 %vm368_vm0, %v1197_v2 }
 0x12f   :  { %1044 = vmatmul.msk.f32.gmra.mxu2 %vm368_vm0, %v1197_v2  ;;  %1052 = vmatmul.msk.f32.gmra.mxu3 %vm368_vm0, %v1197_v2  ;;  %v1641_v1 = vpop.f32.mrf.mxu0  ;;  %v1643_v4 = vpop.f32.mrf.mxu1 }
 0x136   :  { %v1645_v5 = vpop.f32.mrf.mxu2  ;;  %v1647_v6 = vpop.f32.mrf.mxu3 }
 0x139   :  { %v1649_v3 = vpop.f32.mrf.mxu0  ;;  %v1651_v7 = vpop.f32.mrf.mxu1 }
 0x140   :  { %v1653_v8 = vpop.f32.mrf.mxu2  ;;  %v1655_v9 = vpop.f32.mrf.mxu3 }
 0x143   :  { %v408_v35 = vpop.f32.mrf.mxu0  ;;  %v449_v49 = vpop.f32.mrf.mxu1 }
 0x144   :  { %v409_v48 = vadd.f32 %v408_v35, %v1687_v58  ;;  %v450_v11 = vadd.f32 %v449_v49, %v1687_v58 }
 0x14a   :  { %v1657_v50 = vpop.f32.mrf.mxu2  ;;  %v1659_v2 = vpop.f32.mrf.mxu3 }
 0x14b   :  { %v411_v52 = vpop.f32.mrf.mxu0  ;;  %v452_v53 = vpop.f32.mrf.mxu1 }
 0x14c   :  { %v412_v37 = vadd.f32 %v411_v52, %v1681_v30  ;;  %v453_v38 = vadd.f32 %v452_v53, %v1681_v30  ;;  %v1701_v52 = vpop.permute.xlu1 %341 }
 0x14d   :  { %v447_v35 = vadd.f32 %v1651_v7, %v1701_v52 }
 0x152   :  { %v1661_v56 = vpop.f32.mrf.mxu2  ;;  %v1663_v57 = vpop.f32.mrf.mxu3 }
 0x153   :  { %v414_v54 = vpop.f32.mrf.mxu0  ;;  %v455_v59 = vpop.f32.mrf.mxu1 }
 0x154   :  { %v415_v45 = vadd.f32 %v414_v54, %v1675_v26  ;;  %v456_v51 = vadd.f32 %v455_v59, %v1675_v26 }
 0x156   :  { %v745_v33 = vmax.f32 %v415_v45, 0.0  ;;  %v746_v18 = vmax.f32 %v456_v51, 0.0  ;;  %v488_v45 = vadd.f32 %v1653_v8, %v1701_v52 }
 0x158   :  { %v723_v8 = vmax.f32 %v488_v45, 0.0 }
 0x15a   :  { %v1665_v61 = vpop.f32.mrf.mxu2  ;;  %v1667_v55 = vpop.f32.mrf.mxu3 }
 0x15b   :  { %v417_v62 = vpop.f32.mrf.mxu0  ;;  %v458_v63 = vpop.f32.mrf.mxu1  ;;  %v497_v49 = vadd.f32 %v1665_v61, %v1675_v26  ;;  %v494_v61 = vadd.f32 %v1661_v56, %v1681_v30  ;;  %v532_v56 = vadd.f32 %v1659_v2, %v1687_v58 }
 0x15c   :  { %v418_v20 = vadd.f32 %v417_v62, %v1671_v19  ;;  %v459_v43 = vadd.f32 %v458_v63, %v1671_v19  ;;  %v737_v63 = vmax.f32 %v412_v37, 0.0 }
 0x15d   :  { %v739_v51 = vmax.f32 %v494_v61, 0.0 }
 0x15e   :  { %v753_v12 = vmax.f32 %v418_v20, 0.0  ;;  %v754_v32 = vmax.f32 %v459_v43, 0.0  ;;  %v722_v20 = vmax.f32 %v447_v35, 0.0  ;;  %v747_v43 = vmax.f32 %v497_v49, 0.0 }
 0x162   :  { %v499_v21 = vpop.f32.mrf.mxu2  ;;  %v540_v22 = vpop.f32.mrf.mxu3 }
 0x163   :  { %v420_v16 = vpop.f32.mrf.mxu0  ;;  %v461_v24 = vpop.f32.mrf.mxu1  ;;  %v500_v53 = vadd.f32 %v499_v21, %v1671_v19  ;;  %v541_v54 = vadd.f32 %v540_v22, %v1671_v19  ;;  %v538_v21 = vadd.f32 %v1667_v55, %v1675_v26  ;;  %v535_v55 = vadd.f32 %v1663_v57, %v1681_v30 }
 0x164   :  { %v421_v60 = vadd.f32 %v420_v16, %v1669_v0  ;;  %v462_v27 = vadd.f32 %v461_v24, %v1669_v0  ;;  %v738_v16 = vmax.f32 %v453_v38, 0.0  ;;  %v406_v24 = vadd.f32 %v1649_v3, %v1701_v52 }
 0x165   :  { %v748_v57 = vmax.f32 %v538_v21, 0.0  ;;  %v740_v2 = vmax.f32 %v535_v55, 0.0  ;;  %v732_v38 = vmax.f32 %v532_v56, 0.0 }
 0x166   :  { %v761_v36 = vmax.f32 %v421_v60, 0.0  ;;  %v762_v44 = vmax.f32 %v462_v27, 0.0  ;;  %v1709_v60 = vpop.permute.xlu2 %337 }
 0x167   :  { %v403_v3 = vadd.f32 %v1641_v1, %v1709_v60  ;;  %v444_v7 = vadd.f32 %v1643_v4, %v1709_v60  ;;  %v721_v1 = vmax.f32 %v406_v24, 0.0  ;;  %v491_v4 = vadd.f32 %v1657_v50, %v1687_v58  ;;  %v1758_v24 = vld [vmem:[%s1832_s2] sm:$0x3]  ;;  %s1169_s2 = smov [#allocation7]  }
 0x168   :  { %v529_v50 = vadd.f32 %v1655_v9, %v1701_v52  ;;  %779 = vperm.xlu0 %1083, %v1758_v24   ;;  %s976_s24 = sshll.u32 %s1169_s2, 4  ;;  %s977_s24 = int_to_ptr.vmem [resolvable:$true] %s976_s24 }
 0x169   :  { %v731_v37 = vmax.f32 %v491_v4, 0.0 }
 0x16a   :  { %v502_v40 = vpop.f32.mrf.mxu2  ;;  %v543_v23 = vpop.f32.mrf.mxu3 }
 0x16b   :  { %v423_v28 = vpop.f32.mrf.mxu0  ;;  %v464_v31 = vpop.f32.mrf.mxu1  ;;  %v503_v13 = vadd.f32 %v502_v40, %v1669_v0  ;;  %v544_v10 = vadd.f32 %v543_v23, %v1669_v0  ;;  %v729_v40 = vmax.f32 %v409_v48, 0.0  ;;  %v730_v23 = vmax.f32 %v450_v11, 0.0 }
 0x16c   :  { %v424_v29 = vadd.f32 %v423_v28, %v1673_v25  ;;  %v465_v34 = vadd.f32 %v464_v31, %v1673_v25  ;;  %v755_v28 = vmax.f32 %v500_v53, 0.0  ;;  %v756_v31 = vmax.f32 %v541_v54, 0.0 }
 0x16d   :  { %v763_v22 = vmax.f32 %v503_v13, 0.0  ;;  %v764_v27 = vmax.f32 %v544_v10, 0.0 }
 0x16e   :  { %v769_v17 = vmax.f32 %v424_v29, 0.0  ;;  %v770_v46 = vmax.f32 %v465_v34, 0.0 }
 0x170   :  { %792 = vmatpush.msra.mxu0 %v769_v17  ;;  %812 = vmatpush.msra.mxu1 %v770_v46  ;;  %v713_v17 = vmax.f32 %v403_v3, 0.0  ;;  %v714_v46 = vmax.f32 %v444_v7, 0.0 }
 0x172   :  { %v505_v39 = vpop.f32.mrf.mxu2  ;;  %v546_v41 = vpop.f32.mrf.mxu3  ;;  %793 = vmatpush.msra.mxu0 %v761_v36  ;;  %813 = vmatpush.msra.mxu1 %v762_v44 }
 0x173   :  { %v506_v42 = vadd.f32 %v505_v39, %v1673_v25  ;;  %v547_v14 = vadd.f32 %v546_v41, %v1673_v25  ;;  %v1695_v15 = vpop.f32.mrf.mxu0  ;;  %v1697_v47 = vpop.f32.mrf.mxu1  ;;  %v724_v39 = vmax.f32 %v529_v50, 0.0 }
 0x174   :  { %794 = vmatpush.msra.mxu0 %v753_v12  ;;  %814 = vmatpush.msra.mxu1 %v754_v32  ;;  %v485_v12 = vadd.f32 %v1645_v5, %v1709_v60  ;;  %v526_v32 = vadd.f32 %v1647_v6, %v1709_v60 }
 0x175   :  { %v771_v59 = vmax.f32 %v506_v42, 0.0  ;;  %v772_v62 = vmax.f32 %v547_v14, 0.0 }
 0x176   :  { %795 = vmatpush.msra.mxu0 %v745_v33  ;;  %815 = vmatpush.msra.mxu1 %v746_v18  ;;  %v715_v42 = vmax.f32 %v485_v12, 0.0  ;;  %v716_v14 = vmax.f32 %v526_v32, 0.0 }
 0x177   :  { %832 = vmatpush.msra.mxu2 %v771_v59  ;;  %852 = vmatpush.msra.mxu3 %v772_v62 }
 0x178   :  { %796 = vmatpush.msra.mxu0 %v737_v63  ;;  %816 = vmatpush.msra.mxu1 %v738_v16 }
 0x179   :  { %833 = vmatpush.msra.mxu2 %v763_v22  ;;  %853 = vmatpush.msra.mxu3 %v764_v27 }
 0x17a   :  { %v1723_v29 = vpop.f32.mrf.mxu2  ;;  %v1725_v34 = vpop.f32.mrf.mxu3  ;;  %797 = vmatpush.msra.mxu0 %v729_v40  ;;  %817 = vmatpush.msra.mxu1 %v730_v23 }
 0x17b   :  { %834 = vmatpush.msra.mxu2 %v755_v28  ;;  %854 = vmatpush.msra.mxu3 %v756_v31  ;;  %v1731_v36 = vpop.f32.mrf.mxu0  ;;  %v1733_v44 = vpop.f32.mrf.mxu1 }
 0x17c   :  { %798 = vmatpush.msra.mxu0 %v721_v1  ;;  %818 = vmatpush.msra.mxu1 %v722_v20 }
 0x17d   :  { %835 = vmatpush.msra.mxu2 %v747_v43  ;;  %855 = vmatpush.msra.mxu3 %v748_v57 }
 0x17e   :  { %799 = vmatpush.msra.mxu0 %v713_v17  ;;  %819 = vmatpush.msra.mxu1 %v714_v46 }
 0x17f   :  { %836 = vmatpush.msra.mxu2 %v739_v51  ;;  %856 = vmatpush.msra.mxu3 %v740_v2 }
 0x180   :  { %1054 = vmatmul.msk.f32.vlgmr.msra.gmra.mxu1 %vm368_vm0, %v1758_v24  ;;  %1053 = vmatmul.msk.f32.vlgmr.msra.gmra.mxu0 %vm368_vm0, %v1758_v24 }
 0x181   :  { %837 = vmatpush.msra.mxu2 %v731_v37  ;;  %857 = vmatpush.msra.mxu3 %v732_v38 }
 0x182   :  { %v1743_v9 = vpop.f32.mrf.mxu2  ;;  %v1745_v41 = vpop.f32.mrf.mxu3 }
 0x183   :  { %838 = vmatpush.msra.mxu2 %v723_v8  ;;  %858 = vmatpush.msra.mxu3 %v724_v39  ;;  %v572_v13 = vpop.f32.mrf.mxu0  ;;  %v613_v10 = vpop.f32.mrf.mxu1 }
 0x184   :  { %v573_v39 = vadd.f32 %v572_v13, %v1687_v58 }
 0x185   :  { %839 = vmatpush.msra.mxu2 %v715_v42  ;;  %859 = vmatpush.msra.mxu3 %v716_v14  ;;  %v614_v42 = vadd.f32 %v613_v10, %v1687_v58 }
 0x186   :  { %1055 = vmatmul.msk.f32.vlgmr.msra.gmra.mxu2 %vm368_vm0, %v1758_v24  ;;  %1056 = vmatmul.msk.f32.vlgmr.msra.gmra.mxu3 %vm368_vm0, %v1758_v24 }
 0x18a   :  { %v1747_v5 = vpop.f32.mrf.mxu2  ;;  %v1749_v33 = vpop.f32.mrf.mxu3 }
 0x18b   :  { %v575_v6 = vpop.f32.mrf.mxu0  ;;  %v616_v18 = vpop.f32.mrf.mxu1 }
 0x18c   :  { %v576_v46 = vadd.f32 %v575_v6, %v1681_v30  ;;  %v617_v45 = vadd.f32 %v616_v18, %v1681_v30 }
 0x18e   :  { %v742_v13 = vmax.f32 %v617_v45, 0.0 }
 0x192   :  { %v1751_v48 = vpop.f32.mrf.mxu2  ;;  %v1753_v11 = vpop.f32.mrf.mxu3 }
 0x193   :  { %v578_v53 = vpop.f32.mrf.mxu0  ;;  %v619_v54 = vpop.f32.mrf.mxu1 }
 0x194   :  { %v579_v56 = vadd.f32 %v578_v53, %v1675_v26  ;;  %v620_v43 = vadd.f32 %v619_v54, %v1675_v26 }
 0x196   :  { %v749_v14 = vmax.f32 %v579_v56, 0.0  ;;  %v750_v6 = vmax.f32 %v620_v43, 0.0 }
 0x19a   :  { %v660_v59 = vpop.f32.mrf.mxu2  ;;  %v701_v62 = vpop.f32.mrf.mxu3 }
 0x19b   :  { %v581_v63 = vpop.f32.mrf.mxu0  ;;  %v622_v16 = vpop.f32.mrf.mxu1  ;;  %v661_v10 = vadd.f32 %v660_v59, %v1675_v26 }
 0x19c   :  { %v582_v31 = vadd.f32 %v581_v63, %v1671_v19  ;;  %v623_v1 = vadd.f32 %v622_v16, %v1671_v19  ;;  %v741_v16 = vmax.f32 %v576_v46, 0.0 }
 0x19e   :  { %v757_v50 = vmax.f32 %v582_v31, 0.0  ;;  %v758_v51 = vmax.f32 %v623_v1, 0.0 }
 0x1a2   :  { %v663_v35 = vpop.f32.mrf.mxu2  ;;  %v704_v49 = vpop.f32.mrf.mxu3 }
 0x1a3   :  { %v584_v21 = vpop.f32.mrf.mxu0  ;;  %v625_v22 = vpop.f32.mrf.mxu1  ;;  %v664_v18 = vadd.f32 %v663_v35, %v1671_v19  ;;  %v705_v53 = vadd.f32 %v704_v49, %v1671_v19  ;;  %v567_v19 = vadd.f32 %v1695_v15, %v1709_v60  ;;  %v733_v49 = vmax.f32 %v573_v39, 0.0 }
 0x1a4   :  { %v585_v7 = vadd.f32 %v584_v21, %v1669_v0  ;;  %v626_v61 = vadd.f32 %v625_v22, %v1669_v0  ;;  %v702_v21 = vadd.f32 %v701_v62, %v1675_v26  ;;  %v699_v26 = vadd.f32 %v1753_v11, %v1681_v30 }
 0x1a5   :  { %v759_v59 = vmax.f32 %v664_v18, 0.0  ;;  %v760_v62 = vmax.f32 %v705_v53, 0.0  ;;  %v655_v15 = vadd.f32 %v1747_v5, %v1687_v58  ;;  %v652_v11 = vadd.f32 %v1743_v9, %v1701_v52 }
 0x1a6   :  { %v765_v57 = vmax.f32 %v585_v7, 0.0  ;;  %v766_v17 = vmax.f32 %v626_v61, 0.0  ;;  %v752_v7 = vmax.f32 %v702_v21, 0.0  ;;  %v693_v61 = vadd.f32 %v1745_v41, %v1701_v52 }
 0x1a7   :  { %v690_v5 = vadd.f32 %v1725_v34, %v1709_v60 }
 0x1a8   :  { %v728_v9 = vmax.f32 %v693_v61, 0.0 }
 0x1a9   :  { %v720_v1 = vmax.f32 %v690_v5, 0.0 }
 0x1aa   :  { %v666_v27 = vpop.f32.mrf.mxu2  ;;  %v707_v40 = vpop.f32.mrf.mxu3 }
 0x1ab   :  { %v587_v23 = vpop.f32.mrf.mxu0  ;;  %v628_v3 = vpop.f32.mrf.mxu1  ;;  %v667_v38 = vadd.f32 %v666_v27, %v1669_v0  ;;  %v708_v12 = vadd.f32 %v707_v40, %v1669_v0  ;;  %v570_v0 = vadd.f32 %v1731_v36, %v1701_v52  ;;  %v608_v36 = vadd.f32 %v1697_v47, %v1709_v60 }
 0x1ac   :  { %v588_v55 = vadd.f32 %v587_v23, %v1673_v25  ;;  %v629_v28 = vadd.f32 %v628_v3, %v1673_v25  ;;  %v658_v27 = vadd.f32 %v1751_v48, %v1681_v30  ;;  %v696_v47 = vadd.f32 %v1749_v33, %v1687_v58 }
 0x1ad   :  { %v767_v22 = vmax.f32 %v667_v38, 0.0  ;;  %v768_v35 = vmax.f32 %v708_v12, 0.0  ;;  %v725_v40 = vmax.f32 %v570_v0, 0.0  ;;  %v751_v3 = vmax.f32 %v661_v10, 0.0 }
 0x1ae   :  { %v773_v20 = vmax.f32 %v588_v55, 0.0  ;;  %v774_v4 = vmax.f32 %v629_v28, 0.0  ;;  %v717_v48 = vmax.f32 %v567_v19, 0.0  ;;  %v718_v30 = vmax.f32 %v608_v36, 0.0 }
 0x1af   :  { %v743_v55 = vmax.f32 %v658_v27, 0.0  ;;  %v744_v28 = vmax.f32 %v699_v26, 0.0  ;;  %v649_v58 = vadd.f32 %v1723_v29, %v1709_v60  ;;  %v735_v33 = vmax.f32 %v655_v15, 0.0 }
 0x1b0   :  { %872 = vmatpush.msrb.mxu0 %v773_v20  ;;  %892 = vmatpush.msrb.mxu1 %v774_v4  ;;  %v736_v31 = vmax.f32 %v696_v47, 0.0 }
 0x1b1   :  { %v719_v41 = vmax.f32 %v649_v58, 0.0 }
 0x1b2   :  { %v669_v2 = vpop.f32.mrf.mxu2  ;;  %v710_v37 = vpop.f32.mrf.mxu3  ;;  %873 = vmatpush.msrb.mxu0 %v765_v57  ;;  %893 = vmatpush.msrb.mxu1 %v766_v17 }
 0x1b3   :  { %v670_v32 = vadd.f32 %v669_v2, %v1673_v25  ;;  %v711_v8 = vadd.f32 %v710_v37, %v1673_v25  ;;  %v611_v25 = vadd.f32 %v1733_v44, %v1701_v52  ;;  %v734_v44 = vmax.f32 %v614_v42, 0.0 }
 0x1b4   :  { %874 = vmatpush.msrb.mxu0 %v757_v50  ;;  %894 = vmatpush.msrb.mxu1 %v758_v51  ;;  %v727_v52 = vmax.f32 %v652_v11, 0.0 }
 0x1b5   :  { %v775_v54 = vmax.f32 %v670_v32, 0.0  ;;  %v776_v63 = vmax.f32 %v711_v8, 0.0  ;;  %v726_v23 = vmax.f32 %v611_v25, 0.0 }
 0x1b6   :  { %875 = vmatpush.msrb.mxu0 %v749_v14  ;;  %895 = vmatpush.msrb.mxu1 %v750_v6 }
 0x1b7   :  { %912 = vmatpush.msrb.mxu2 %v775_v54  ;;  %932 = vmatpush.msrb.mxu3 %v776_v63 }
 0x1b8   :  { %876 = vmatpush.msrb.mxu0 %v741_v16  ;;  %896 = vmatpush.msrb.mxu1 %v742_v13 }
 0x1b9   :  { %913 = vmatpush.msrb.mxu2 %v767_v22  ;;  %933 = vmatpush.msrb.mxu3 %v768_v35 }
 0x1ba   :  { %877 = vmatpush.msrb.mxu0 %v733_v49  ;;  %897 = vmatpush.msrb.mxu1 %v734_v44 }
 0x1bb   :  { %914 = vmatpush.msrb.mxu2 %v759_v59  ;;  %934 = vmatpush.msrb.mxu3 %v760_v62 }
 0x1bc   :  { %878 = vmatpush.msrb.mxu0 %v725_v40  ;;  %898 = vmatpush.msrb.mxu1 %v726_v23 }
 0x1bd   :  { %915 = vmatpush.msrb.mxu2 %v751_v3  ;;  %935 = vmatpush.msrb.mxu3 %v752_v7 }
 0x1be   :  { %879 = vmatpush.msrb.mxu0 %v717_v48  ;;  %899 = vmatpush.msrb.mxu1 %v718_v30 }
 0x1bf   :  { %916 = vmatpush.msrb.mxu2 %v743_v55  ;;  %936 = vmatpush.msrb.mxu3 %v744_v28 }
 0x1c0   :  { %1058 = vmatmul.msk.f32.vlgmr.msrb.gmra.mxu1 %vm368_vm0, %v1758_v24  ;;  %1057 = vmatmul.msk.f32.vlgmr.msrb.gmra.mxu0 %vm368_vm0, %v1758_v24 }
 0x1c1   :  { %917 = vmatpush.msrb.mxu2 %v735_v33  ;;  %937 = vmatpush.msrb.mxu3 %v736_v31 }
 0x1c3   :  { %918 = vmatpush.msrb.mxu2 %v727_v52  ;;  %938 = vmatpush.msrb.mxu3 %v728_v9 }
 0x1c5   :  { %919 = vmatpush.msrb.mxu2 %v719_v41  ;;  %939 = vmatpush.msrb.mxu3 %v720_v1 }
 0x1c6   :  { %1059 = vmatmul.msk.f32.vlgmr.msrb.gmra.mxu2 %vm368_vm0, %v1758_v24  ;;  %1060 = vmatmul.msk.f32.vlgmr.msrb.gmra.mxu3 %vm368_vm0, %v1758_v24 }
 0x1da   :  { %v780_v60 = vpop.permute.xlu0 %779 }
 0x1fd   :  { %v821_v20 = vpop.f32.mrf.mxu1  ;;  %v801_v57 = vpop.f32.mrf.mxu0 }
 0x1fe   :  { %v822_v4 = vadd.f32 %v821_v20, %v780_v60  ;;  %v802_v17 = vadd.f32 %v801_v57, %v780_v60 }
 0x200   :  { %v952_v46 = vrot.slane %v822_v4, 6 }
 0x202   :  { %v959_v51 = vsel %vm958_vm1, %v802_v17, %v952_v46 }
 0x209   :  { %v841_v29 = vpop.f32.mrf.mxu2  ;;  %v861_v34 = vpop.f32.mrf.mxu3 }
 0x20a   :  { %v842_v56 = vadd.f32 %v841_v29, %v780_v60  ;;  %v862_v43 = vadd.f32 %v861_v34, %v780_v60 }
 0x20c   :  { %v953_v45 = vrot.slane %v842_v56, 4  ;;  %v954_v50 = vrot.slane %v862_v43, 2 }
 0x20e   :  { %v961_v2 = vsel %vm960_vm2, %v953_v45, %v954_v50 }
 0x20f   :  { %v963_v24 = vsel %vm962_vm3, %v959_v51, %v961_v2 }
 0x210   :  { %969 = vst [vmem:[#allocation7] sm:$0xff] %v963_v24 }
 0x23d   :  { %v901_v37 = vpop.f32.mrf.mxu1  ;;  %v881_v12 = vpop.f32.mrf.mxu0 }
 0x23e   :  { %v902_v38 = vadd.f32 %v901_v37, %v780_v60  ;;  %v882_v42 = vadd.f32 %v881_v12, %v780_v60 }
 0x240   :  { %v955_v39 = vrot.slane %v902_v38, 6 }
 0x242   :  { %v964_v54 = vsel %vm958_vm1, %v882_v42, %v955_v39 }
 0x249   :  { %v921_v32 = vpop.f32.mrf.mxu2  ;;  %v941_v8 = vpop.f32.mrf.mxu3 }
 0x24a   :  { %v922_v14 = vadd.f32 %v921_v32, %v780_v60  ;;  %v942_v6 = vadd.f32 %v941_v8, %v780_v60 }
 0x24c   :  { %v956_v18 = vrot.slane %v922_v14, 4  ;;  %v957_v53 = vrot.slane %v942_v6, 2 }
 0x24e   :  { %v965_v63 = vsel %vm960_vm2, %v956_v18, %v957_v53 }
 0x24f   :  { %v966_v0 = vsel %vm962_vm3, %v964_v54, %v965_v63 }
 0x250   :  { %970 = vst [vmem:[#allocation7 + $0x8] sm:$0xff] %v966_v0 }
 0x251   :  { %981 = dma.vmem_to_hbm [thread:$0]  %s977_s24, 256, %s979_s27, [#allocation4]  }
 0x252   :  { %1160 = dma.done.wait [#allocation4], 256  }
 0x253   :  { %1161 = vsyncadd [#allocation4], 4294967040 }
 0x254   :  { %986 = vsyncpa [#allocation3], 1 }
 0x255   :  { %987 = vsyncpa [#allocation6], 1 }
 0x256   :  { %988 = vsyncpa [#allocation4], 1 }

</bundles_post_ra>
